<compile_context>
chip_gen: v7x
topology: tpu7x:2x2x1
jax: 0.10.0
libtpu: 0.0.40
codegen_flags: <defaults>
</compile_context>

<pallas_src>
import jax
import jax.numpy as jnp
from jax import lax
from jax.experimental import pallas as pl
from jax.experimental.pallas import tpu as pltpu

_LN_EPS = 1e-5  # torch.nn.LayerNorm default


def _layernorm_f32(x, gamma, beta):
    mu = jnp.mean(x, axis=-1, keepdims=True)
    xc = x - mu
    var = jnp.mean(xc * xc, axis=-1, keepdims=True)
    return xc * lax.rsqrt(var + _LN_EPS) * gamma + beta


# ---------------------------------------------------------------------------
# m path: LayerNorm over C_m
# ---------------------------------------------------------------------------
def _m_ln_kernel(m_ref, g_ref, b_ref, o_ref):
    x = m_ref[...].astype(jnp.float32)
    g = g_ref[...].astype(jnp.float32)
    b = b_ref[...].astype(jnp.float32)
    o_ref[...] = _layernorm_f32(x, g, b).astype(o_ref.dtype)


# ---------------------------------------------------------------------------
# distance path: lane-dense pairwise squared distances (rows on sublanes,
# all residues on the 128-lane axis).  Tiny: O(N^2) f32 output.
# ---------------------------------------------------------------------------
def _d2_kernel(xi_ref, xt_ref, o_ref):
    xi = xi_ref[0].astype(jnp.float32)          # (tr, 3)   tile rows, sublane-major
    xt = xt_ref[0].astype(jnp.float32)          # (3, N)    all residues, lane-dense
    d2 = None
    for c in range(3):
        diff = xi[:, c:c + 1] - xt[c:c + 1, :]  # (tr,1) - (1,N) -> (tr, N)
        sq = diff * diff
        d2 = sq if d2 is None else d2 + sq
    o_ref[0] = d2.astype(o_ref.dtype)           # single full-block lane-dense store


# ---------------------------------------------------------------------------
# z path: fused one-hot distogram linear + LayerNorm(z) + add, on the
# flattened pair axis.  Everything is 2-D; one matmul / one store per chunk.
# ---------------------------------------------------------------------------
_PAIR_CHUNK = 2048  # pairs per in-kernel chunk (bounds f32 temporaries / vregs)


def _z_kernel(d2_ref, z_ref, sqb_ref, up_ref, wt_ref, lb_ref, gz_ref, bz_ref,
              o_ref):
    tp = z_ref.shape[1]                          # pairs in this block (static)

    sqb = sqb_ref[...]                           # (1, no_bins) f32
    up = up_ref[...]                             # (1, no_bins) f32
    wt = wt_ref[...].astype(jnp.float32)         # (no_bins, C_z)  (= W^T)
    lb = lb_ref[...].astype(jnp.float32)         # (1, C_z)
    gz = gz_ref[...].astype(jnp.float32)         # (1, C_z)
    bz = bz_ref[...].astype(jnp.float32)         # (1, C_z)

    pc = tp if tp <= _PAIR_CHUNK else _PAIR_CHUNK
    for s in range(0, tp, pc):                   # static chunk loop (<= ~8 iters)
        sz = min(pc, tp - s)
        d2 = d2_ref[0, s:s + sz, :]                                      # (sz, 1)
        onehot = jnp.logical_and(d2 > sqb, d2 < up).astype(jnp.float32)  # (sz, K)
        # One MXU matmul per chunk, default precision (one-hot LHS is exact).
        d_lin = jnp.dot(onehot, wt, preferred_element_type=jnp.float32) + lb
        zc = z_ref[0, s:s + sz, :].astype(jnp.float32)                   # (sz, C_z)
        out = d_lin + _layernorm_f32(zc, gz, bz)
        o_ref[0, s:s + sz, :] = out.astype(o_ref.dtype)                  # lane-dense store


# ---------------------------------------------------------------------------
# Tiling helpers
# ---------------------------------------------------------------------------
def _round_down8(v):
    return max(8, (v // 8) * 8)


def _pick_pair_tile(total_pairs, c_z, itemsize, batch,
                    target_bytes=4 << 20, min_steps=8, floor_pairs=512):
    """Pairs per z block: ~4 MiB of z, multiple of 8 (or the full pair axis),
    while keeping >= min_steps grid steps for megacore sharding when possible."""
    tp = max(1, target_bytes // max(1, c_z * itemsize))
    if tp >= total_pairs:
        tp = total_pairs
    else:
        tp = _round_down8(min(tp, total_pairs))

    def steps(t):
        return batch * ((total_pairs + t - 1) // t)

    while tp > floor_pairs and steps(tp) < min_steps:
        nt = _round_down8(tp // 2)
        if nt >= tp:
            break
        tp = nt
    return tp


def _pick_d2_row_tile(n, target_bytes=4 << 20):
    if n * n * 4 <= target_bytes:
        return n
    return _round_down8(max(8, target_bytes // (n * 4)))


# ---------------------------------------------------------------------------
# Wrapper
# ---------------------------------------------------------------------------
def recycling_embedder(m, z, x, params, *, min_bin, max_bin, no_bins, inf=1e8):
    """
    Args:
        m: [*, N_res, C_m]        first row of the MSA embedding
        z: [*, N_res, N_res, C_z] pair embedding
        x: [*, N_res, 3]          predicted C_beta coordinates
        params: dict with
            'linear_w'  : [C_z, no_bins]  (PyTorch nn.Linear convention)
            'linear_b'  : [C_z]
            'ln_m_gamma': [C_m], 'ln_m_beta': [C_m]
            'ln_z_gamma': [C_z], 'ln_z_beta': [C_z]
    Returns:
        (m_update [*, N_res, C_m], z_update [*, N_res, N_res, C_z])
    """
    assert x.shape[-1] == 3
    n = x.shape[-2]
    c_m = m.shape[-1]
    c_z = z.shape[-1]
    batch_shape = z.shape[:-3]
    b = 1
    for d in batch_shape:
        b *= d

    m2 = m.reshape(b * n, c_m)
    zf = z.reshape(b, n * n, c_z)                # free reshape: flattened pair axis
    x3 = x.reshape(b, n, 3)
    xt = jnp.swapaxes(x3, 1, 2)                  # (b, 3, N) lane-dense coordinates

    # Distogram bin edges in float32 regardless of input dtype.
    bins = jnp.linspace(float(min_bin), float(max_bin), no_bins, dtype=jnp.float32)
    sqb = (bins ** 2).reshape(1, no_bins)
    upper = jnp.concatenate(
        [sqb[:, 1:], jnp.full((1, 1), float(inf), jnp.float32)], axis=-1)

    w_t = params['linear_w'].T.astype(jnp.float32)       # (no_bins, C_z)
    lb = params['linear_b'].reshape(1, c_z).astype(jnp.float32)
    gz = params['ln_z_gamma'].reshape(1, c_z).astype(jnp.float32)
    bz = params['ln_z_beta'].reshape(1, c_z).astype(jnp.float32)
    gm = params['ln_m_gamma'].reshape(1, c_m)
    bm = params['ln_m_beta'].reshape(1, c_m)

    # --- squared-distance map (tiny side stream, lane-dense compute) ---------
    tr = _pick_d2_row_tile(n)
    d2 = pl.pallas_call(
        _d2_kernel,
        out_shape=jax.ShapeDtypeStruct((b, n, n), jnp.float32),
        grid_spec=pltpu.PrefetchScalarGridSpec(
            num_scalar_prefetch=0,
            grid=(b, pl.cdiv(n, tr)),
            in_specs=[
                pl.BlockSpec((1, tr, 3), lambda bi, i: (bi, i, 0)),   # tile rows
                pl.BlockSpec((1, 3, n), lambda bi, i: (bi, 0, 0)),    # all residues (T)
            ],
            out_specs=pl.BlockSpec((1, tr, n), lambda bi, i: (bi, i, 0)),
        ),
        compiler_params=pltpu.CompilerParams(
            dimension_semantics=("parallel", "parallel")),
    )(x3, xt)
    d2 = d2.reshape(b, n * n, 1)                 # free reshape: pairs on sublanes

    # --- fused distogram-linear + LayerNorm(z) + add --------------------------
    itemsize = jnp.dtype(z.dtype).itemsize
    tp = _pick_pair_tile(n * n, c_z, itemsize, b)
    grid_z = (b, pl.cdiv(n * n, tp))

    pairs = b * n * n
    z_cost = pl.CostEstimate(
        flops=int(pairs * (2 * no_bins * c_z + 10 * c_z)),
        transcendentals=int(pairs),
        bytes_accessed=int(2 * pairs * c_z * itemsize + pairs * 4),
    )

    z_update = pl.pallas_call(
        _z_kernel,
        out_shape=jax.ShapeDtypeStruct((b, n * n, c_z), z.dtype),
        grid_spec=pltpu.PrefetchScalarGridSpec(
            num_scalar_prefetch=0,
            grid=grid_z,
            in_specs=[
                pl.BlockSpec((1, tp, 1), lambda bi, i: (bi, i, 0)),      # d2 (pairs)
                pl.BlockSpec((1, tp, c_z), lambda bi, i: (bi, i, 0)),    # z (pairs)
                pl.BlockSpec((1, no_bins), lambda bi, i: (0, 0)),        # squared bins
                pl.BlockSpec((1, no_bins), lambda bi, i: (0, 0)),        # upper edges
                pl.BlockSpec((no_bins, c_z), lambda bi, i: (0, 0)),      # W^T (resident)
                pl.BlockSpec((1, c_z), lambda bi, i: (0, 0)),            # linear bias
                pl.BlockSpec((1, c_z), lambda bi, i: (0, 0)),            # LN_z gamma
                pl.BlockSpec((1, c_z), lambda bi, i: (0, 0)),            # LN_z beta
            ],
            out_specs=pl.BlockSpec((1, tp, c_z), lambda bi, i: (bi, i, 0)),
        ),
        compiler_params=pltpu.CompilerParams(
            dimension_semantics=("parallel", "parallel"),
            vmem_limit_bytes=48 * 1024 * 1024),
        cost_estimate=z_cost,
    )(d2, zf, sqb, upper, w_t, lb, gz, bz)

    # --- m path (tiny): row-tiled LayerNorm -----------------------------------
    m_rows = b * n
    tm = m_rows if m_rows <= 1024 else 1024
    m_itemsize = jnp.dtype(m.dtype).itemsize
    m_cost = pl.CostEstimate(
        flops=int(m_rows * c_m * 8),
        transcendentals=int(m_rows),
        bytes_accessed=int(2 * m_rows * c_m * m_itemsize),
    )
    m_update = pl.pallas_call(
        _m_ln_kernel,
        out_shape=jax.ShapeDtypeStruct((m_rows, c_m), m.dtype),
        grid_spec=pltpu.PrefetchScalarGridSpec(
            num_scalar_prefetch=0,
            grid=(pl.cdiv(m_rows, tm),),
            in_specs=[
                pl.BlockSpec((tm, c_m), lambda i: (i, 0)),
                pl.BlockSpec((1, c_m), lambda i: (0, 0)),
                pl.BlockSpec((1, c_m), lambda i: (0, 0)),
            ],
            out_specs=pl.BlockSpec((tm, c_m), lambda i: (i, 0)),
        ),
        compiler_params=pltpu.CompilerParams(
            dimension_semantics=("parallel",)),
        cost_estimate=m_cost,
    )(m2, gm, bm)

    m_update = m_update.reshape(*batch_shape, n, c_m)
    z_update = z_update.reshape(*batch_shape, n, n, c_z)
    return m_update, z_update


# ---------------------------------------------------------------------------
# Pure-JAX reference (mirrors the PyTorch module)
# ---------------------------------------------------------------------------
def _reference(m, z, x, params, min_bin, max_bin, no_bins, inf):
    bins = jnp.linspace(min_bin, max_bin, no_bins, dtype=jnp.float32)
    sqb = bins ** 2
    upper = jnp.concatenate([sqb[1:], jnp.asarray([inf], dtype=jnp.float32)])

    def ln(t, g, b_):
        mu = jnp.mean(t, -1, keepdims=True)
        var = jnp.mean((t - mu) ** 2, -1, keepdims=True)
        return (t - mu) / jnp.sqrt(var + _LN_EPS) * g + b_

    m_update = ln(m, params['ln_m_gamma'], params['ln_m_beta'])
    d = jnp.sum((x[..., None, :] - x[..., None, :, :]) ** 2, axis=-1,
                keepdims=True)
    d = jnp.logical_and(d > sqb, d < upper).astype(x.dtype)
    d = jnp.einsum('...b,cb->...c', d, params['linear_w'],
                   precision=lax.Precision.HIGHEST) + params['linear_b']
    z_update = d + ln(z, params['ln_z_gamma'], params['ln_z_beta'])
    return m_update, z_update


if __name__ == "__main__":
    key = jax.random.PRNGKey(0)
    ks = jax.random.split(key, 8)

    batch, n_res = 2, 16
    c_m, c_z, no_bins = 32, 128, 15
    min_bin, max_bin, inf = 3.25, 20.75, 1e8

    m = jax.random.normal(ks[0], (batch, n_res, c_m), jnp.float32)
    z = jax.random.normal(ks[1], (batch, n_res, n_res, c_z), jnp.float32)
    # scale coords so pairwise squared distances span the distogram bins
    x = 8.0 * jax.random.normal(ks[2], (batch, n_res, 3), jnp.float32)

    params = {
        'linear_w': 0.1 * jax.random.normal(ks[3], (c_z, no_bins), jnp.float32),
        'linear_b': 0.1 * jax.random.normal(ks[4], (c_z,), jnp.float32),
        'ln_m_gamma': 1.0 + 0.1 * jax.random.normal(ks[5], (c_m,), jnp.float32),
        'ln_m_beta': 0.1 * jax.random.normal(ks[6], (c_m,), jnp.float32),
        'ln_z_gamma': 1.0 + 0.1 * jax.random.normal(ks[7], (c_z,), jnp.float32),
        'ln_z_beta': jnp.zeros((c_z,), jnp.float32),
    }

    m_up, z_up = recycling_embedder(m, z, x, params, min_bin=min_bin,
                                    max_bin=max_bin, no_bins=no_bins, inf=inf)
    m_up, z_up = jax.block_until_ready((m_up, z_up))

    m_ref, z_ref = _reference(m, z, x, params, min_bin, max_bin, no_bins, inf)

    assert m_up.shape == (batch, n_res, c_m)
    assert z_up.shape == (batch, n_res, n_res, c_z)
    assert jnp.allclose(m_up, m_ref, atol=1e-4, rtol=1e-4), \
        float(jnp.max(jnp.abs(m_up - m_ref)))
    assert jnp.allclose(z_up, z_ref, atol=2e-3, rtol=1e-3), \
        float(jnp.max(jnp.abs(z_up - z_ref)))

    print("KERNEL_OK")
</pallas_src>

<mosaic_0001>
module attributes {stable_mosaic.version = 11 : i64} {
  func.func @_d2_kernel(%arg0: i32, %arg1: i32, %arg2: memref<1x16x3xf32, #tpu.memory_space<vmem>>, %arg3: memref<1x3x16xf32, #tpu.memory_space<vmem>>, %arg4: memref<1x16x16xf32, #tpu.memory_space<vmem>>) attributes {dimension_semantics = [#tpu.dimension_semantics<parallel>, #tpu.dimension_semantics<parallel>], iteration_bounds = array<i64: 2, 1>, scalar_prefetch = 0 : i64, scratch_operands = 0 : i64, tpu.core_type = #tpu.core_type<tc>, window_params = [{transform_indices = @transform_0, window_bounds = array<i64: 1, 16, 3>}, {transform_indices = @transform_1, window_bounds = array<i64: 1, 3, 16>}, {transform_indices = @transform_2, window_bounds = array<i64: 1, 16, 16>}]} {
    %c0 = arith.constant 0 : index
    %c0_0 = arith.constant 0 : index
    %c0_1 = arith.constant 0 : index
    %0 = vector.load %arg2[%c0, %c0_0, %c0_1] : memref<1x16x3xf32, #tpu.memory_space<vmem>>, vector<1x16x3xf32>
    %1 = vector.shape_cast %0 : vector<1x16x3xf32> to vector<16x3xf32>
    %c0_2 = arith.constant 0 : index
    %c0_3 = arith.constant 0 : index
    %c0_4 = arith.constant 0 : index
    %2 = vector.load %arg3[%c0_2, %c0_3, %c0_4] : memref<1x3x16xf32, #tpu.memory_space<vmem>>, vector<1x3x16xf32>
    %3 = vector.shape_cast %2 : vector<1x3x16xf32> to vector<3x16xf32>
    %4 = vector.extract_strided_slice %1 {offsets = [0, 0], sizes = [16, 1], strides = [1, 1]} : vector<16x3xf32> to vector<16x1xf32>
    %5 = vector.extract_strided_slice %3 {offsets = [0, 0], sizes = [1, 16], strides = [1, 1]} : vector<3x16xf32> to vector<1x16xf32>
    %6 = vector.broadcast %4 : vector<16x1xf32> to vector<16x16xf32>
    %7 = vector.broadcast %5 : vector<1x16xf32> to vector<16x16xf32>
    %8 = arith.subf %6, %7 : vector<16x16xf32>
    %9 = arith.mulf %8, %8 : vector<16x16xf32>
    %10 = vector.extract_strided_slice %1 {offsets = [0, 1], sizes = [16, 1], strides = [1, 1]} : vector<16x3xf32> to vector<16x1xf32>
    %11 = vector.extract_strided_slice %3 {offsets = [1, 0], sizes = [1, 16], strides = [1, 1]} : vector<3x16xf32> to vector<1x16xf32>
    %12 = vector.broadcast %10 : vector<16x1xf32> to vector<16x16xf32>
    %13 = vector.broadcast %11 : vector<1x16xf32> to vector<16x16xf32>
    %14 = arith.subf %12, %13 : vector<16x16xf32>
    %15 = arith.mulf %14, %14 : vector<16x16xf32>
    %16 = arith.addf %9, %15 : vector<16x16xf32>
    %17 = vector.extract_strided_slice %1 {offsets = [0, 2], sizes = [16, 1], strides = [1, 1]} : vector<16x3xf32> to vector<16x1xf32>
    %18 = vector.extract_strided_slice %3 {offsets = [2, 0], sizes = [1, 16], strides = [1, 1]} : vector<3x16xf32> to vector<1x16xf32>
    %19 = vector.broadcast %17 : vector<16x1xf32> to vector<16x16xf32>
    %20 = vector.broadcast %18 : vector<1x16xf32> to vector<16x16xf32>
    %21 = arith.subf %19, %20 : vector<16x16xf32>
    %22 = arith.mulf %21, %21 : vector<16x16xf32>
    %23 = arith.addf %16, %22 : vector<16x16xf32>
    %c0_5 = arith.constant 0 : index
    %c0_6 = arith.constant 0 : index
    %c0_7 = arith.constant 0 : index
    %24 = vector.load %arg4[%c0_5, %c0_6, %c0_7] : memref<1x16x16xf32, #tpu.memory_space<vmem>>, vector<1x16x16xf32>
    %25 = vector.shape_cast %24 : vector<1x16x16xf32> to vector<16x16xf32>
    %26 = vector.shape_cast %23 : vector<16x16xf32> to vector<1x16x16xf32>
    tpu.vector_store %arg4[%c0_5, %c0_6, %c0_7], %26 {strides = array<i32>} : memref<1x16x16xf32, #tpu.memory_space<vmem>>, vector<1x16x16xf32>,
    return
  }
  func.func @transform_0(%arg0: i32, %arg1: i32) -> (i32, i32, i32) {
    %c0_i32 = arith.constant 0 : i32
    %c0_i32_0 = arith.constant 0 : i32
    return %arg0, %arg1, %c0_i32 : i32, i32, i32
  }
  func.func @transform_1(%arg0: i32, %arg1: i32) -> (i32, i32, i32) {
    %c0_i32 = arith.constant 0 : i32
    %c0_i32_0 = arith.constant 0 : i32
    %c0_i32_1 = arith.constant 0 : i32
    return %arg0, %c0_i32, %c0_i32_0 : i32, i32, i32
  }
  func.func @transform_2(%arg0: i32, %arg1: i32) -> (i32, i32, i32) {
    %c0_i32 = arith.constant 0 : i32
    %c0_i32_0 = arith.constant 0 : i32
    return %arg0, %arg1, %c0_i32 : i32, i32, i32
  }
}

</mosaic_0001>

<bundles_post_ra>
// kernel: tpu_custom_call.1
= control target key start
LH: loop header
LB: loop body
LE: loop exit
PB: predicated region body
PF: predicated region fallthrough
CT: control target
= control target key end

     0   :  { %7 = vsyncpa [#allocation3], 0  ;;  %s660_s0 = inlined_call_operand.vmem [shape: f32[2,16,3], index: 0, kind: input, shape index: {}]   ;;  %s661_s1 = inlined_call_operand.vmem [shape: f32[2,3,16], index: 1, kind: input, shape index: {}]   ;;  %s662_s2 = inlined_call_operand.hbm [shape: f32[2,16,16], index: 2, kind: output, shape index: {}]  }
   0x1   :  { %9 = vsyncpa [#allocation3 + $0x1], 0  ;;  %s538_s9 = smov 0   ;;  %s540_s10 = smov 0  }
   0x2   :  { %s542_s11 = smov 0   ;;  %s544_s12 = smov 0  }
   0x3   :  { %s546_s13 = smov 0   ;;  %s548_s14 = smov 0  }
   0x4 LB: > { %s357_s15 = sadd.s32 4294967295, %s515_s14   ;;  %s358_s16 = sadd.s32 4294967294, %s515_s14   ;;  %s515_s14 = sphi %s548_s14, %s15_s14   ;;  %s511_s13 = sphi %s546_s13, %s669_s13   ;;  %s507_s12 = sphi %s544_s12, %s668_s12   ;;  %s503_s11 = sphi %s542_s11, %s667_s11   ;;  %s499_s10 = sphi %s540_s10, %s666_s10   ;;  %s495_s9 = sphi %s538_s9, %s665_s9  }
   0x5   : > { %s27_s17 = sadd.s32 1, %s511_s13  ;;  %s90_s18 = sadd.s32 1, %s503_s11 }
   0x6   : > { %p29_p0 = scmp.ge.s32.totalorder %s27_s17, 2  ;;  %p100_p1 = scmp.ne.s32.totalorder %s503_s11, %s499_s10 }
   0x7   : > { %p101_p2 = scmp.eq.s32.totalorder %s357_s15, 1  ;;  %p106_p3 = scmp.ne.s32.totalorder %s499_s10, %s495_s9 }
   0x8   : > { %s671_s17 = smov (%p29_p0, %s27_s17), 0  ;;  %p107_p5 = scmp.eq.s32.totalorder %s358_s16, 1 }
   0x9   : > { %p578_p4 = por %p101_p2, %p100_p1  ;;  %s85_s20 = ssub.s32 %s511_s13, %s671_s17 }
   0xa   : > { %p361_p6 = scmp.ge.s32.totalorder %s515_s14, 1  ;;  %p88_p7 = scmp.eq.s32.totalorder %s85_s20, 0 }
   0xb   : > { %p585_p8 = por %p107_p5, %p106_p3  ;;  %p145_p9 = scmp.lt.s32.totalorder %s515_s14, 3 }
   0xc   : > { %s591_s22 = scalar_select %p88_p7, %s503_s11, %s90_s18  }
   0xd   : > { %p146_p10 = pnand %p361_p6, %p145_p9 }
   0xe   : > { %p176_p11 = scmp.lt.s32.totalorder (!%p146_p10), %s507_s12, 1  ;;  %v517_v0 = vmov (!%p146_p10), 1   ;;  %v518_v1 = vmov (!%p146_p10), 0   ;;  %v519_v4 = vmov (!%p146_p10), 2   ;;  %v203_v5 = vlaneseq (!%p146_p10)  ;;  %s172_s4 = sand.u32 (!%p146_p10), 1, %s499_s10  }
   0xf   : > { %149 = sbr.rel (%p146_p10) target bundleno = 185 (0xb9), region = 28  ;;  %434 = vset.pattern.permute.xlu1 (!%p146_p10), %v517_v0  ;;  %433 = vset.pattern.permute.xlu0 (!%p146_p10), %v518_v1  ;;  %s362_s5 = sshll.u32 (!%p146_p10), %s172_s4, 4  ;;  %vm247_vm0 = vcmask (!%p146_p10), 130048  }
  0x10   : > { %v204_v6 = vshrl.u32 (!%p146_p10), %v203_v5, 7  ;;  %s372_s6 = sshll.u32 (!%p146_p10), %s507_s12, 8  ;;  %s174_s7 = scalar_lea.vmem (!%p146_p10), [#allocation2], %s362_s5 }
  0x11   : > { %s266_s8 = sshll.u32 (!%p146_p10), %s174_s7, 4  ;;  %s608_s18 = scalar_lea.hbm (!%p146_p10), %s662_s2, %s372_s6  ;;  %s610_s8 = int_to_ptr.vmem [resolvable:$true] %s266_s8 }
  0x12   : > { %v221_v7 = vsub.s32 (!%p146_p10), 1, %v204_v6  ;;  %v205_v8 = vsub.s32 (!%p146_p10), 0, %v204_v6  ;;  %v239_v14 = vsub.s32 (!%p146_p10), 2, %v204_v6  ;;  %s437_s20 = scalar_lea.vmem (!%p146_p10), %s610_s8, 256 }
  0x13   : > { %p438_p12 = scmp.ne.s32.totalorder (!%p146_p10), %s610_s8, %s437_s20 }
  0x15   : > { %p439_p13 = pnand (!%p146_p10), %p438_p12, %p578_p4 }
  0x16   : > { %s177_s23 = scalar_select %p176_p11, %s507_s12, 1 }
  0x17   : > { %s614_s12 = scalar_lea.sflag [#allocation3], %s172_s4  ;;  %p440_p0 = pneg %p439_p13 }
  0x18   : > { %s371_s24 = sshll.u32 %s177_s23, 4  ;;  %s365_s28 = sshll.u32 %s177_s23, 2 }
  0x19   : > { %s183_s27 = scalar_lea.vmem %s660_s0, %s371_s24  ;;  %s188_s3 = scalar_lea.vmem %s661_s1, %s365_s28 }
  0x1a   : > { %v190_v2 = vld [vmem:[%s183_s27] sm:$0xff]  ;;  %v191_v3 = vld [vmem:[%s183_s27 + $0x8] sm:$0xff]  ;;  %s520_s23 = smov [#allocation2]  }
  0x1b   : > { %212 = vperm.xlu1 %434, %v190_v2   ;;  %195 = vperm.xlu0 %433, %v190_v2   ;;  %v192_v9 = vld [vmem:[%s188_s3] sm:$0x7]  ;;  %s441_s24 = sshll.u32 %s520_s23, 4  ;;  %s442_s24 = int_to_ptr.vmem [resolvable:$false] %s441_s24 }
  0x1c   : > { %v222_v10 = vrot.slane %v192_v9, %v221_v7  ;;  %v206_v12 = vrot.slane %v192_v9, %v205_v8  ;;  %v240_v21 = vrot.slane %v192_v9, %v239_v14  ;;  %s443_s25 = scalar_lea.vmem %s442_s24, 512  ;;  %p444_p1 = scmp.lt.s32.totalorder %s610_s8, %s442_s24 }
  0x1d   : > { %p445_p2 = scmp.lt.s32.totalorder %s443_s25, %s437_s20 }
  0x1f   : > { %216 = vperm.xlu1 %434, %v191_v3   ;;  %200 = vperm.xlu0 %433, %v191_v3   ;;  %p446_p3 = por %p445_p2, %p444_p1 }
  0x21   : > { %p447_p5 = pnand %p446_p3, %p440_p0 }
  0x23   : > { %436 = vset.pattern.permute.xlu1 %v519_v4  ;;  %435 = vset.pattern.permute.xlu0 %v519_v4 }
  0x24   : > { %234 = vperm.xlu1 %436, %v191_v3   ;;  %230 = vperm.xlu0 %435, %v190_v2  }
  0x9a   : > { %v213_v11 = vpop.permute.xlu1 %212  ;;  %v196_v13 = vpop.permute.xlu0 %195 }
  0x9b   : > { %v223_v15 = vsub.f32 %v213_v11, %v222_v10  ;;  %v207_v16 = vsub.f32 %v196_v13, %v206_v12 }
  0x9d   : > { %v225_v22 = vmul.f32 %v223_v15, %v223_v15  ;;  %v209_v23 = vmul.f32 %v207_v16, %v207_v16 }
  0x9e   : > { %v217_v17 = vpop.permute.xlu1 %216  ;;  %v201_v18 = vpop.permute.xlu0 %200 }
  0x9f   : > { %v224_v19 = vsub.f32 %v217_v17, %v222_v10  ;;  %v208_v20 = vsub.f32 %v201_v18, %v206_v12  ;;  %v227_v30 = vadd.f32 %v225_v22, %v209_v23 }
  0xa1   : > { %v226_v24 = vmul.f32 %v224_v19, %v224_v19  ;;  %v210_v25 = vmul.f32 %v208_v20, %v208_v20 }
  0xa3   : > { %v235_v26 = vpop.permute.xlu1 %234  ;;  %v231_v27 = vpop.permute.xlu0 %230  ;;  %v228_v31 = vadd.f32 %v226_v24, %v210_v25 }
  0xa4   : > { %v242_v28 = vsub.f32 %v235_v26, %v240_v21  ;;  %v241_v29 = vsub.f32 %v231_v27, %v240_v21 }
  0xa6   : > { %v244_v32 = vmul.f32 %v242_v28, %v242_v28  ;;  %v243_v33 = vmul.f32 %v241_v29, %v241_v29 }
  0xa8   : > { %v246_v34 = vadd.f32 %v244_v32, %v228_v31  ;;  %v245_v35 = vadd.f32 %v243_v33, %v227_v30 }
  0xaa   : > { %249 = vst.msk [vmem:[%s174_s7 + $0x8] sm:$0xff] %vm247_vm0, %v246_v34  ;;  %248 = vst.msk [vmem:[%s174_s7] sm:$0xff] %vm247_vm0, %v245_v35 }
  0xab   : > { %450 = shalt.err (!%p447_p5)
}
  0xac   : > { %s451_s26 = scalar_lea.hbm %s608_s18, 256  ;;  %s455_s29 = scalar_lea.hbm %s662_s2, 512 }
  0xad   : > { %p452_p6 = scmp.ne.s32.totalorder %s608_s18, %s451_s26  ;;  %p456_p10 = scmp.lt.u32.totalorder %s608_s18, %s662_s2 }
  0xae   : > { %p457_p11 = scmp.lt.u32.totalorder %s455_s29, %s451_s26  ;;  %p459_p13 = scmp.lt.u32.totalorder %s451_s26, %s608_s18 }
  0xaf   : > { %p453_p7 = pnand %p452_p6, %p578_p4 }
  0xb0   : > { %p458_p12 = por %p457_p11, %p456_p10 }
  0xb1   : > { %p454_p9 = pneg %p453_p7 }
  0xb2   : > { %p460_p0 = por %p459_p13, %p458_p12 }
  0xb4   : > { %p461_p1 = pnand %p460_p0, %p454_p9 }
  0xb6   : > { %464 = shalt.err (!%p461_p1)
}
  0xb7   : > { %s521_s4 = smov 128   ;;  %s522_s5 = smov 8  }
  0xb8   : > { %373 = dma.vmem_to_hbm [thread:$0]  (%p578_p4), %s610_s8, 256, %s608_s18, %s614_s12, %s521_s4, %s521_s4, %s522_s5  }
  0xb9 PF: > { %p379_p2 = scmp.ge.s32.totalorder %s515_s14, 2  ;;  %s281_s6 = sand.u32 1, %s495_s9  }
  0xba   : > { %s282_s7 = scalar_lea.sflag [#allocation3], %s281_s6 }
  0xbb   : > { %p376_p3 = pnand %p379_p2, %p585_p8 }
  0xbd   : > { %490 = dma.done.wait (!%p376_p3), %s282_s7, 256  }
  0xbe   : > { %492 = vsyncadd (!%p376_p3), %s282_s7, 4294967040  ;;  %s15_s14 = sadd.s32 1, %s515_s14   ;;  %s665_s9 = smov %s499_s10 }
  0xbf   : > { %p12_p5 = scmp.ge.s32.totalorder %s15_s14, 4   ;;  %s666_s10 = smov %s503_s11 }
  0xc0   : > { %s667_s11 = smov %s591_s22  ;;  %s668_s12 = smov %s511_s13 }
  0xc1   : > { %s669_s13 = smov %s671_s17  ;;  %14 = sbr.rel (!%p12_p5) target bundleno = 4 (0x4), region = 66 }
  0xc8   :  { %287 = vsyncpa [#allocation3], 1 }
  0xc9   :  { %289 = vsyncpa [#allocation3 + $0x1], 1 }

</bundles_post_ra>
